<compile_context>
chip_gen: v7x
topology: tpu7x:2x2x1
jax: 0.10.0
libtpu: 0.0.40
codegen_flags: <defaults>
</compile_context>

<pallas_src>
import functools

import jax
import jax.numpy as jnp
from jax.experimental import pallas as pl
from jax.experimental.pallas import tpu as pltpu


# ----------------------------------------------------------------------------
# Fused Pallas kernel: out = A @ (relu(A @ (X @ W1) + b1) @ W2pad) + b2pad
# Single program (grid=()); A_hat DMA'd manually and overlapped with X@W1.
# ----------------------------------------------------------------------------
def _fused_gcn_kernel(a_hbm, x_ref, w1_ref, b1_ref, w2_ref, b2_ref, o_ref,
                      a_vmem, a_sem):
    # Kick off the A_hat copy first; it is the largest input and grid=() has
    # no automatic pipelining, so hide it behind the first matmul.
    a_copy = pltpu.make_async_copy(a_hbm, a_vmem, a_sem)
    a_copy.start()

    # Layer 1 feature transform: X @ W1 (bf16 inputs, f32 MXU accumulation).
    xw1 = jnp.dot(x_ref[...], w1_ref[...], preferred_element_type=jnp.float32)

    a_copy.wait()
    a = a_vmem[...]  # (N, N) bf16 normalized adjacency

    # Layer 1 aggregation + bias + ReLU (bf16 single-pass MXU, f32 accum).
    h1 = jnp.dot(a, xw1.astype(jnp.bfloat16),
                 preferred_element_type=jnp.float32) + b1_ref[...]
    h1 = jnp.maximum(h1, 0.0)

    # Layer 2: A_hat @ (h1 @ W2pad) + b2pad.
    hw2 = jnp.dot(h1.astype(jnp.bfloat16), w2_ref[...],
                  preferred_element_type=jnp.float32)
    out = jnp.dot(a, hw2.astype(jnp.bfloat16),
                  preferred_element_type=jnp.float32) + b2_ref[...]

    o_ref[...] = out.astype(o_ref.dtype)


def prepare_params(params, lane=128):
    """One-time: bf16 weight casts + lane-dense padding of the output head."""
    w1, b1, w2, b2 = params
    h = w1.shape[1]
    d = w2.shape[1]
    dp = ((d + lane - 1) // lane) * lane
    w2p = jnp.zeros((h, dp), jnp.float32).at[:, :d].set(w2).astype(jnp.bfloat16)
    b2p = jnp.zeros((1, dp), jnp.float32).at[0, :d].set(b2)
    return (
        w1.astype(jnp.bfloat16),
        b1.reshape(1, h).astype(jnp.float32),
        w2p,
        b2p,
    )


@functools.partial(jax.jit, static_argnames=("output_dim",))
def feature_gcn_forward(x, a_hat, prepared, *, output_dim):
    """Runs the fused 2-layer GCN forward in one pallas_call."""
    w1b, b1r, w2p, b2p = prepared
    n, f = x.shape
    h = w1b.shape[1]
    dp = w2p.shape[1]

    flops = 2.0 * (n * f * h + n * n * h + n * h * dp + n * n * dp)
    bytes_accessed = (
        2 * n * n          # A_hat bf16
        + 2 * n * f        # X bf16
        + 2 * f * h        # W1 bf16
        + 4 * h            # b1 f32
        + 2 * h * dp       # W2 bf16 (padded)
        + 4 * dp           # b2 f32 (padded)
        + 4 * n * dp       # output f32
    )

    out_padded = pl.pallas_call(
        _fused_gcn_kernel,
        out_shape=jax.ShapeDtypeStruct((n, dp), jnp.float32),
        in_specs=[
            pl.BlockSpec(memory_space=pl.ANY),                  # A_hat (manual DMA)
            pl.BlockSpec(memory_space=pltpu.MemorySpace.VMEM),  # X
            pl.BlockSpec(memory_space=pltpu.MemorySpace.VMEM),  # W1
            pl.BlockSpec(memory_space=pltpu.MemorySpace.VMEM),  # b1
            pl.BlockSpec(memory_space=pltpu.MemorySpace.VMEM),  # W2 (padded)
            pl.BlockSpec(memory_space=pltpu.MemorySpace.VMEM),  # b2 (padded)
        ],
        out_specs=pl.BlockSpec(memory_space=pltpu.MemorySpace.VMEM),
        scratch_shapes=[
            pltpu.VMEM((n, n), jnp.bfloat16),   # A_hat landing buffer
            pltpu.SemaphoreType.DMA(()),        # its completion semaphore
        ],
        cost_estimate=pl.CostEstimate(
            flops=int(flops),
            transcendentals=0,
            bytes_accessed=int(bytes_accessed),
        ),
    )(
        a_hat.astype(jnp.bfloat16),
        x.astype(jnp.bfloat16),
        w1b,
        b1r,
        w2p,
        b2p,
    )
    return out_padded[:, :output_dim]


# ----------------------------------------------------------------------------
# Glue: dense normalized adjacency from edge_index (PyG GCNConv gcn_norm)
# ----------------------------------------------------------------------------
@functools.partial(jax.jit, static_argnames=("num_nodes",))
def build_normalized_adjacency(edge_index, *, num_nodes):
    loops = jnp.arange(num_nodes, dtype=edge_index.dtype)
    row = jnp.concatenate([edge_index[0], loops])
    col = jnp.concatenate([edge_index[1], loops])
    ew = jnp.ones_like(row, dtype=jnp.float32)
    # deg over targets (col), norm = d^{-1/2}[row] * d^{-1/2}[col]
    deg = jnp.zeros((num_nodes,), jnp.float32).at[col].add(ew)
    dinv = jnp.where(deg > 0, 1.0 / jnp.sqrt(deg), 0.0)
    norm = dinv[row] * dinv[col]
    # out[col] += norm * x[row]  =>  A_hat[col, row] += norm
    a_hat = jnp.zeros((num_nodes, num_nodes), jnp.float32).at[col, row].add(norm)
    return a_hat


def init_params(key, input_dim, hidden_dim, output_dim):
    k1, k2 = jax.random.split(key)
    w1 = jax.random.normal(k1, (input_dim, hidden_dim), jnp.float32) * (
        (2.0 / (input_dim + hidden_dim)) ** 0.5
    )
    b1 = jnp.zeros((hidden_dim,), jnp.float32)
    w2 = jax.random.normal(k2, (hidden_dim, output_dim), jnp.float32) * (
        (2.0 / (hidden_dim + output_dim)) ** 0.5
    )
    b2 = jnp.zeros((output_dim,), jnp.float32)
    return (w1, b1, w2, b2)


if __name__ == "__main__":
    # Small shapes consistent with the module (num_images scaled 50 -> 2):
    features_per_image = 128
    num_images = 2
    num_nodes = num_images * features_per_image  # 256
    feature_dim = 256
    hidden_dim = 128
    output_dim = 64

    key = jax.random.PRNGKey(0)
    kx, ke, kp = jax.random.split(key, 3)

    x = jax.random.normal(kx, (num_nodes, feature_dim), jnp.float32)
    edge_index = jax.random.randint(
        ke, (2, num_nodes * 3), 0, num_nodes, dtype=jnp.int32
    )
    params = init_params(kp, feature_dim, hidden_dim, output_dim)
    prepared = prepare_params(params)

    a_hat = build_normalized_adjacency(edge_index, num_nodes=num_nodes)

    out = feature_gcn_forward(x, a_hat, prepared, output_dim=output_dim)
    out = jax.block_until_ready(out)

    # Reference in plain JAX at full f32 precision. The kernel runs all four
    # matmuls with bf16 MXU inputs (f32 accumulation), so compare with a
    # bf16-appropriate tolerance.
    w1, b1, w2, b2 = params
    hp = jax.lax.Precision.HIGHEST
    h1_ref = jnp.maximum(
        jnp.dot(a_hat, jnp.dot(x, w1, precision=hp), precision=hp) + b1, 0.0
    )
    ref = jnp.dot(a_hat, jnp.dot(h1_ref, w2, precision=hp), precision=hp) + b2

    assert out.shape == (num_nodes, output_dim)
    max_err = float(jnp.max(jnp.abs(out - ref)))
    assert jnp.allclose(out, ref, atol=5e-2, rtol=5e-2), max_err

    print("KERNEL_OK")
</pallas_src>

<mosaic_0001>
module attributes {stable_mosaic.version = 11 : i64} {
  func.func private @main(%arg0: i32) attributes {dimension_semantics = [#tpu.dimension_semantics<core_parallel>], iteration_bounds = array<i64: 2>, tpu.core_type = #tpu.core_type<sc_scalar_subcore>, window_params = []} {
    return
  }
}

module attributes {stable_mosaic.version = 11 : i64} {
  func.func private @main(%arg0: i32) attributes {dimension_semantics = [#tpu.dimension_semantics<core_parallel>], iteration_bounds = array<i64: 2>, tpu.core_type = #tpu.core_type<sc_scalar_subcore>, window_params = []} {
    return
  }
}

</mosaic_0001>

<bundles_post_ra>
// kernel: mul.1
= control target key start
LH: loop header
LB: loop body
LE: loop exit
PB: predicated region body
PF: predicated region fallthrough
CT: control target
= control target key end

     0   :  { %s34_s0 = inlined_call_operand.vmem [shape: f32[1024], index: 0, kind: input, shape index: {}]   ;;  %s35_s1 = inlined_call_operand.vmem [shape: f32[1024], index: 1, kind: input, shape index: {}]   ;;  %s36_s2 = inlined_call_operand.vmem [shape: f32[1024], index: 2, kind: output, shape index: {}]  }
   0x1   :  { %v3_v0 = vld [vmem:[%s34_s0] sm:$0xff] }
   0x2   :  { %v4_v1 = vld [vmem:[%s35_s1] sm:$0xff] }
   0x3   :  { %v7_v2 = vmul.f32 %v4_v1, %v3_v0 }
   0x5   :  { %9 = vst [vmem:[%s36_s2] sm:$0xff] %v7_v2 }

</bundles_post_ra>
